<compile_context>
chip_gen: v5e
topology: v5e:2x2
jax: 0.10.0
libtpu: 0.0.40
codegen_flags: <defaults>
</compile_context>

<pallas_src>
import jax
import jax.numpy as jnp
from jax import lax
from jax.experimental import pallas as pl
from jax.experimental.pallas import tpu as pltpu

LANE = 128      # TPU lane width (last dim)
SUBLANE = 8     # TPU sublane width (second-to-last dim)
LN_EPS = 1e-5   # torch.nn.LayerNorm default eps


def _round_up(n, m):
    return ((n + m - 1) // m) * m


def _pad2d(a, rows, cols):
    r, c = a.shape
    if r == rows and c == cols:
        return a
    return jnp.pad(a, ((0, rows - r), (0, cols - c)))


# ---------------------------------------------------------------------------
# Fused kernel: (num_layers-1) x [Linear -> ReLU -> LayerNorm] + Linear
# ---------------------------------------------------------------------------
def _make_mlp_kernel(num_layers, c_hid_real, use_bf16_matmul):
    """LN affine is pre-folded into the following layer's weights, so the
    kernel only normalizes.  Hidden feature axes are zero-padded to 128 lanes
    host-side; LN stats use only the real `c_hid_real` width (padded lanes of
    the pre-LN activation are exactly 0 after ReLU, so full-lane sums equal
    real-width sums and no mask is needed)."""
    mm_dtype = jnp.bfloat16 if use_bf16_matmul else jnp.float32
    inv_c = 1.0 / float(c_hid_real)

    def kernel(x_ref, *refs):
        o_ref = refs[-1]
        wb_refs = refs[:-1]            # w1, b1, w2, b2, ..., wL, bL
        h = x_ref[...]                 # (tile_n, c_in) f32

        for layer in range(num_layers):
            w = wb_refs[2 * layer][...]        # pre-cast (bf16 or f32) host-side
            b = wb_refs[2 * layer + 1][...]    # f32
            h = jnp.dot(h.astype(mm_dtype), w,
                        preferred_element_type=jnp.float32) + b

            if layer < num_layers - 1:
                h = jnp.maximum(h, 0.0)                      # ReLU
                # LayerNorm (affine folded into next W/b); f32 statistics.
                mean = jnp.sum(h, axis=-1, keepdims=True) * inv_c
                var = jnp.maximum(
                    jnp.sum(h * h, axis=-1, keepdims=True) * inv_c - mean * mean,
                    0.0)
                h = (h - mean) * lax.rsqrt(var + LN_EPS)
                # dropout in eval mode is identity -> nothing to do

        o_ref[...] = h                 # (tile_n, c_out) f32

    return kernel


# ---------------------------------------------------------------------------
# Parameter preprocessing: fold LN affine into next layer, pad hidden axes to
# 128 lanes, pre-cast weights to the matmul dtype (biases stay f32).
# ---------------------------------------------------------------------------
def prepare_params(params, c_hid_pad, use_bf16_matmul):
    num_layers = len(params)
    ws = [p["w"] for p in params]
    bs = [p["b"].reshape(1, -1) for p in params]

    for l in range(num_layers - 1):               # fold LN(l) into layer l+1
        g = params[l]["gamma"].reshape(-1)        # (C_hid,)
        beta = params[l]["beta"].reshape(1, -1)   # (1, C_hid)
        w_next = ws[l + 1]                        # original (un-scaled) weight
        bs[l + 1] = bs[l + 1] + beta @ w_next     # b' = beta @ W + b
        ws[l + 1] = g[:, None] * w_next           # W' = diag(gamma) @ W

    w_dtype = jnp.bfloat16 if use_bf16_matmul else jnp.float32
    flat = []
    for l in range(num_layers):
        r, c = ws[l].shape
        rp = c_hid_pad if l > 0 else r                 # input-feature axis
        cp = c_hid_pad if l < num_layers - 1 else c    # output-feature axis
        w = _pad2d(ws[l].astype(jnp.float32), rp, cp).astype(w_dtype)
        b = _pad2d(bs[l].astype(jnp.float32), 1, cp)   # bias added post-acc in f32
        flat.append(w)
        flat.append(b)
    return flat


# ---------------------------------------------------------------------------
# Wrapper
# ---------------------------------------------------------------------------
def _row_dim_semantics(num_steps):
    """CORE_PARALLEL on v7x (2 TCs) when there is actual row parallelism;
    plain "parallel" otherwise (near-zero codegen delta on 1-TC chips)."""
    if num_steps >= 2:
        try:
            kind = jax.devices()[0].device_kind.lower()
            if "v7" in kind:
                return (pltpu.CORE_PARALLEL,)
        except Exception:
            pass
    return ("parallel",)


def mlp_forward_fused(x, params, *, use_bf16_matmul=True, row_tile=2048,
                      x_buffers=2):
    n, c_in = x.shape
    num_layers = len(params)
    c_hid = params[0]["w"].shape[1]
    c_out = params[-1]["w"].shape[1]
    c_hid_pad = _round_up(c_hid, LANE)

    # Row tiling: one big tile for small N, `row_tile`-row tiles for large N.
    # VMEM footprint at 2048 rows: x ~256 KiB + out ~128 KiB (double-buffered)
    # + <100 KiB weights -> far below every generation's scoped-VMEM default.
    tile_n = min(_round_up(n, SUBLANE), row_tile)
    n_pad = _round_up(n, tile_n)

    x_p = x.astype(jnp.float32)
    if n_pad != n:
        x_p = jnp.pad(x_p, ((0, n_pad - n), (0, 0)))     # row pad only

    flat_wb = prepare_params(params, c_hid_pad, use_bf16_matmul)
    kernel = _make_mlp_kernel(num_layers, c_hid, use_bf16_matmul)

    # x: row-tiled, full (un-padded) feature width -> K = c_in matmul.
    x_spec_kwargs = {}
    if x_buffers != 2:
        # Only deepen buffering if a profile shows exposed x DMA at big tiles.
        x_spec_kwargs["pipeline_mode"] = pl.Buffered(x_buffers)
    in_specs = [pl.BlockSpec((tile_n, c_in), lambda i: (i, 0), **x_spec_kwargs)]
    for arr in flat_wb:
        # weights/biases: constant index_map -> VMEM-resident across all steps
        in_specs.append(pl.BlockSpec(arr.shape, lambda i: (0, 0)))

    num_steps = n_pad // tile_n

    out = pl.pallas_call(
        kernel,
        out_shape=jax.ShapeDtypeStruct((n_pad, c_out), jnp.float32),
        grid=(num_steps,),
        in_specs=in_specs,
        out_specs=pl.BlockSpec((tile_n, c_out), lambda i: (i, 0)),
        compiler_params=pltpu.CompilerParams(
            dimension_semantics=_row_dim_semantics(num_steps)),
    )(x_p, *flat_wb)

    return out[:n] if n_pad != n else out


# ---------------------------------------------------------------------------
# Parameter init (torch.nn.Linear-style) + pure-JAX reference.
# ---------------------------------------------------------------------------
def init_linear(key, c_in, c_out):
    kw, kb = jax.random.split(key)
    bound = 1.0 / (c_in ** 0.5)
    w = jax.random.uniform(kw, (c_in, c_out), jnp.float32, -bound, bound)  # pre-transposed
    b = jax.random.uniform(kb, (1, c_out), jnp.float32, -bound, bound)
    return w, b


def mlp_reference(x, params):
    """Pure-JAX reference matching the PyTorch forward (eval mode, 'ln')."""
    h = x
    for layer in params[:-1]:
        h = h @ layer["w"] + layer["b"]
        h = jnp.maximum(h, 0.0)
        mean = jnp.mean(h, axis=-1, keepdims=True)
        var = jnp.mean((h - mean) ** 2, axis=-1, keepdims=True)
        h = (h - mean) * lax.rsqrt(var + LN_EPS)
        h = h * layer["gamma"] + layer["beta"]
    last = params[-1]
    return h @ last["w"] + last["b"]


if __name__ == "__main__":
    # MLP(in_channels=32, hidden_channels=32, out_channels=16, num_layers=3,
    #     dropout=0.5, Normalization='ln', InputNorm=False), eval mode.
    N, C_IN, C_HID, C_OUT, NUM_LAYERS = 8, 32, 32, 16, 3

    key = jax.random.PRNGKey(0)
    key, kx = jax.random.split(key)
    x = jax.random.normal(kx, (N, C_IN), jnp.float32)

    params = []
    dims = [C_IN] + [C_HID] * (NUM_LAYERS - 1) + [C_OUT]
    for i in range(NUM_LAYERS):
        key, kl, kg, kbt = jax.random.split(key, 4)
        w, b = init_linear(kl, dims[i], dims[i + 1])
        layer = {"w": w, "b": b}
        if i < NUM_LAYERS - 1:
            # Non-trivial gamma/beta so the affine-fold path is exercised
            # (torch default would be gamma=1, beta=0).
            layer["gamma"] = jax.random.uniform(kg, (1, dims[i + 1]),
                                                jnp.float32, 0.5, 1.5)
            layer["beta"] = 0.1 * jax.random.normal(kbt, (1, dims[i + 1]),
                                                    jnp.float32)
        params.append(layer)

    ref = mlp_reference(x, params)

    # Exact-f32 path: tight check.
    out_f32 = jax.block_until_ready(
        mlp_forward_fused(x, params, use_bf16_matmul=False))
    assert out_f32.shape == (N, C_OUT)
    assert jnp.allclose(out_f32, ref, atol=1e-4, rtol=1e-4), \
        "f32 path mismatch vs reference"

    # Default path (bf16 matmul inputs, f32 accumulation + f32 LN): loose check.
    out_bf16 = jax.block_until_ready(mlp_forward_fused(x, params))
    assert out_bf16.shape == (N, C_OUT)
    assert jnp.allclose(out_bf16, ref, atol=5e-2, rtol=5e-2), \
        "bf16-matmul path mismatch vs reference"

    print("KERNEL_OK")
</pallas_src>

<mosaic_0001>
module attributes {stable_mosaic.version = 11 : i64} {
  func.func @kernel(%arg0: i32, %arg1: memref<8x32xf32, #tpu.memory_space<vmem>>, %arg2: memref<32x128xf32, #tpu.memory_space<vmem>>, %arg3: memref<1x128xf32, #tpu.memory_space<vmem>>, %arg4: memref<128x128xf32, #tpu.memory_space<vmem>>, %arg5: memref<1x128xf32, #tpu.memory_space<vmem>>, %arg6: memref<128x16xf32, #tpu.memory_space<vmem>>, %arg7: memref<1x16xf32, #tpu.memory_space<vmem>>, %arg8: memref<8x16xf32, #tpu.memory_space<vmem>>) attributes {dimension_semantics = [#tpu.dimension_semantics<parallel>], iteration_bounds = array<i64: 1>, scalar_prefetch = 0 : i64, scratch_operands = 0 : i64, tpu.core_type = #tpu.core_type<tc>, window_params = [{transform_indices = @transform_0, window_bounds = array<i64: 8, 32>}, {pipeline_mode = #tpu.pipeline_mode<synchronous>, transform_indices = @transform_1, window_bounds = array<i64: 32, 128>}, {pipeline_mode = #tpu.pipeline_mode<synchronous>, transform_indices = @transform_2, window_bounds = array<i64: 1, 128>}, {pipeline_mode = #tpu.pipeline_mode<synchronous>, transform_indices = @transform_3, window_bounds = array<i64: 128, 128>}, {pipeline_mode = #tpu.pipeline_mode<synchronous>, transform_indices = @transform_4, window_bounds = array<i64: 1, 128>}, {pipeline_mode = #tpu.pipeline_mode<synchronous>, transform_indices = @transform_5, window_bounds = array<i64: 128, 16>}, {pipeline_mode = #tpu.pipeline_mode<synchronous>, transform_indices = @transform_6, window_bounds = array<i64: 1, 16>}, {transform_indices = @transform_7, window_bounds = array<i64: 8, 16>}]} {
    %c0 = arith.constant 0 : index
    %c0_0 = arith.constant 0 : index
    %0 = vector.load %arg1[%c0, %c0_0] : memref<8x32xf32, #tpu.memory_space<vmem>>, vector<8x32xf32>
    %c0_1 = arith.constant 0 : index
    %c0_2 = arith.constant 0 : index
    %1 = vector.load %arg2[%c0_1, %c0_2] : memref<32x128xf32, #tpu.memory_space<vmem>>, vector<32x128xf32>
    %c0_3 = arith.constant 0 : index
    %c0_4 = arith.constant 0 : index
    %2 = vector.load %arg3[%c0_3, %c0_4] : memref<1x128xf32, #tpu.memory_space<vmem>>, vector<1x128xf32>
    %cst = arith.constant dense<0.000000e+00> : vector<8x128xf32>
    %3 = tpu.matmul %0, %1, %cst {dimension_numbers = #tpu.dot_dimension_numbers<[1], [0], [0], [1], [0, 0, 1, 1], [], []>} : vector<8x32xf32>, vector<32x128xf32>, vector<8x128xf32> -> vector<8x128xf32>
    %4 = vector.broadcast %2 : vector<1x128xf32> to vector<8x128xf32>
    %5 = arith.addf %3, %4 : vector<8x128xf32>
    %cst_5 = arith.constant 0.000000e+00 : f32
    %6 = vector.broadcast %cst_5 : f32 to vector<8x128xf32>
    %7 = arith.maximumf %5, %6 : vector<8x128xf32>
    %cst_6 = arith.constant dense<0.000000e+00> : vector<8xf32>
    %8 = vector.multi_reduction <add>, %7, %cst_6 [1] : vector<8x128xf32> to vector<8xf32>
    %9 = vector.shape_cast %8 : vector<8xf32> to vector<8x1xf32>
    %cst_7 = arith.constant 3.125000e-02 : f32
    %10 = vector.broadcast %cst_7 : f32 to vector<8x1xf32>
    %11 = arith.mulf %9, %10 : vector<8x1xf32>
    %12 = arith.mulf %7, %7 : vector<8x128xf32>
    %cst_8 = arith.constant dense<0.000000e+00> : vector<8xf32>
    %13 = vector.multi_reduction <add>, %12, %cst_8 [1] : vector<8x128xf32> to vector<8xf32>
    %14 = vector.shape_cast %13 : vector<8xf32> to vector<8x1xf32>
    %cst_9 = arith.constant 3.125000e-02 : f32
    %15 = vector.broadcast %cst_9 : f32 to vector<8x1xf32>
    %16 = arith.mulf %14, %15 : vector<8x1xf32>
    %17 = arith.mulf %11, %11 : vector<8x1xf32>
    %18 = arith.subf %16, %17 : vector<8x1xf32>
    %cst_10 = arith.constant 0.000000e+00 : f32
    %19 = vector.broadcast %cst_10 : f32 to vector<8x1xf32>
    %20 = arith.maximumf %18, %19 : vector<8x1xf32>
    %21 = vector.broadcast %11 : vector<8x1xf32> to vector<8x128xf32>
    %22 = arith.subf %7, %21 : vector<8x128xf32>
    %cst_11 = arith.constant 9.99999974E-6 : f32
    %23 = vector.broadcast %cst_11 : f32 to vector<8x1xf32>
    %24 = arith.addf %20, %23 : vector<8x1xf32>
    %25 = math.rsqrt %24 : vector<8x1xf32>
    %26 = vector.broadcast %25 : vector<8x1xf32> to vector<8x128xf32>
    %27 = arith.mulf %22, %26 : vector<8x128xf32>
    %c0_12 = arith.constant 0 : index
    %c0_13 = arith.constant 0 : index
    %28 = vector.load %arg4[%c0_12, %c0_13] : memref<128x128xf32, #tpu.memory_space<vmem>>, vector<128x128xf32>
    %c0_14 = arith.constant 0 : index
    %c0_15 = arith.constant 0 : index
    %29 = vector.load %arg5[%c0_14, %c0_15] : memref<1x128xf32, #tpu.memory_space<vmem>>, vector<1x128xf32>
    %cst_16 = arith.constant dense<0.000000e+00> : vector<8x128xf32>
    %30 = tpu.matmul %27, %28, %cst_16 {dimension_numbers = #tpu.dot_dimension_numbers<[1], [0], [0], [1], [0, 0, 1, 1], [], []>} : vector<8x128xf32>, vector<128x128xf32>, vector<8x128xf32> -> vector<8x128xf32>
    %31 = vector.broadcast %29 : vector<1x128xf32> to vector<8x128xf32>
    %32 = arith.addf %30, %31 : vector<8x128xf32>
    %cst_17 = arith.constant 0.000000e+00 : f32
    %33 = vector.broadcast %cst_17 : f32 to vector<8x128xf32>
    %34 = arith.maximumf %32, %33 : vector<8x128xf32>
    %cst_18 = arith.constant dense<0.000000e+00> : vector<8xf32>
    %35 = vector.multi_reduction <add>, %34, %cst_18 [1] : vector<8x128xf32> to vector<8xf32>
    %36 = vector.shape_cast %35 : vector<8xf32> to vector<8x1xf32>
    %cst_19 = arith.constant 3.125000e-02 : f32
    %37 = vector.broadcast %cst_19 : f32 to vector<8x1xf32>
    %38 = arith.mulf %36, %37 : vector<8x1xf32>
    %39 = arith.mulf %34, %34 : vector<8x128xf32>
    %cst_20 = arith.constant dense<0.000000e+00> : vector<8xf32>
    %40 = vector.multi_reduction <add>, %39, %cst_20 [1] : vector<8x128xf32> to vector<8xf32>
    %41 = vector.shape_cast %40 : vector<8xf32> to vector<8x1xf32>
    %cst_21 = arith.constant 3.125000e-02 : f32
    %42 = vector.broadcast %cst_21 : f32 to vector<8x1xf32>
    %43 = arith.mulf %41, %42 : vector<8x1xf32>
    %44 = arith.mulf %38, %38 : vector<8x1xf32>
    %45 = arith.subf %43, %44 : vector<8x1xf32>
    %cst_22 = arith.constant 0.000000e+00 : f32
    %46 = vector.broadcast %cst_22 : f32 to vector<8x1xf32>
    %47 = arith.maximumf %45, %46 : vector<8x1xf32>
    %48 = vector.broadcast %38 : vector<8x1xf32> to vector<8x128xf32>
    %49 = arith.subf %34, %48 : vector<8x128xf32>
    %cst_23 = arith.constant 9.99999974E-6 : f32
    %50 = vector.broadcast %cst_23 : f32 to vector<8x1xf32>
    %51 = arith.addf %47, %50 : vector<8x1xf32>
    %52 = math.rsqrt %51 : vector<8x1xf32>
    %53 = vector.broadcast %52 : vector<8x1xf32> to vector<8x128xf32>
    %54 = arith.mulf %49, %53 : vector<8x128xf32>
    %c0_24 = arith.constant 0 : index
    %c0_25 = arith.constant 0 : index
    %55 = vector.load %arg6[%c0_24, %c0_25] : memref<128x16xf32, #tpu.memory_space<vmem>>, vector<128x16xf32>
    %c0_26 = arith.constant 0 : index
    %c0_27 = arith.constant 0 : index
    %56 = vector.load %arg7[%c0_26, %c0_27] : memref<1x16xf32, #tpu.memory_space<vmem>>, vector<1x16xf32>
    %cst_28 = arith.constant dense<0.000000e+00> : vector<8x16xf32>
    %57 = tpu.matmul %54, %55, %cst_28 {dimension_numbers = #tpu.dot_dimension_numbers<[1], [0], [0], [1], [0, 0, 1, 1], [], []>} : vector<8x128xf32>, vector<128x16xf32>, vector<8x16xf32> -> vector<8x16xf32>
    %58 = vector.broadcast %56 : vector<1x16xf32> to vector<8x16xf32>
    %59 = arith.addf %57, %58 : vector<8x16xf32>
    %c0_29 = arith.constant 0 : index
    %c0_30 = arith.constant 0 : index
    %60 = vector.load %arg8[%c0_29, %c0_30] : memref<8x16xf32, #tpu.memory_space<vmem>>, vector<8x16xf32>
    tpu.vector_store %arg8[%c0_29, %c0_30], %59 {strides = array<i32>} : memref<8x16xf32, #tpu.memory_space<vmem>>, vector<8x16xf32>,
    return
  }
  func.func @transform_0(%arg0: i32) -> (i32, i32) {
    %c0_i32 = arith.constant 0 : i32
    %c0_i32_0 = arith.constant 0 : i32
    return %arg0, %c0_i32 : i32, i32
  }
  func.func @transform_1(%arg0: i32) -> (i32, i32) {
    %c0_i32 = arith.constant 0 : i32
    %c0_i32_0 = arith.constant 0 : i32
    %c0_i32_1 = arith.constant 0 : i32
    return %c0_i32, %c0_i32_0 : i32, i32
  }
  func.func @transform_2(%arg0: i32) -> (i32, i32) {
    %c0_i32 = arith.constant 0 : i32
    %c0_i32_0 = arith.constant 0 : i32
    %c0_i32_1 = arith.constant 0 : i32
    return %c0_i32, %c0_i32_0 : i32, i32
  }
  func.func @transform_3(%arg0: i32) -> (i32, i32) {
    %c0_i32 = arith.constant 0 : i32
    %c0_i32_0 = arith.constant 0 : i32
    %c0_i32_1 = arith.constant 0 : i32
    return %c0_i32, %c0_i32_0 : i32, i32
  }
  func.func @transform_4(%arg0: i32) -> (i32, i32) {
    %c0_i32 = arith.constant 0 : i32
    %c0_i32_0 = arith.constant 0 : i32
    %c0_i32_1 = arith.constant 0 : i32
    return %c0_i32, %c0_i32_0 : i32, i32
  }
  func.func @transform_5(%arg0: i32) -> (i32, i32) {
    %c0_i32 = arith.constant 0 : i32
    %c0_i32_0 = arith.constant 0 : i32
    %c0_i32_1 = arith.constant 0 : i32
    return %c0_i32, %c0_i32_0 : i32, i32
  }
  func.func @transform_6(%arg0: i32) -> (i32, i32) {
    %c0_i32 = arith.constant 0 : i32
    %c0_i32_0 = arith.constant 0 : i32
    %c0_i32_1 = arith.constant 0 : i32
    return %c0_i32, %c0_i32_0 : i32, i32
  }
  func.func @transform_7(%arg0: i32) -> (i32, i32) {
    %c0_i32 = arith.constant 0 : i32
    %c0_i32_0 = arith.constant 0 : i32
    return %arg0, %c0_i32 : i32, i32
  }
}

</mosaic_0001>

<bundles_post_ra>
// kernel: tpu_custom_call.1
= control target key start
LH: loop header
LB: loop body
LE: loop exit
PB: predicated region body
PF: predicated region fallthrough
CT: control target
= control target key end

     0   :  { %12 = vsyncpa [#allocation3], 0  ;;  %s445_s0 = inlined_call_operand.vmem [shape: f32[8,32], index: 0, kind: input, shape index: {}]   ;;  %s446_s1 = inlined_call_operand.hbm [shape: f32[32,128], index: 1, kind: input, shape index: {}]   ;;  %s447_s2 = inlined_call_operand.vmem [shape: f32[1,128], index: 2, kind: input, shape index: {}]   ;;  %s448_s3 = inlined_call_operand.vmem [shape: f32[128,128], index: 3, kind: input, shape index: {}]   ;;  %s449_s4 = inlined_call_operand.vmem [shape: f32[1,128], index: 4, kind: input, shape index: {}]   ;;  %s450_s5 = inlined_call_operand.vmem [shape: f32[128,16], index: 5, kind: input, shape index: {}]   ;;  %s451_s6 = inlined_call_operand.vmem [shape: f32[1,16], index: 6, kind: input, shape index: {}]   ;;  %s452_s7 = inlined_call_operand.hbm [shape: f32[8,16], index: 7, kind: output, shape index: {}]  }
   0x1   :  { %13 = vsyncpa [#allocation4], 0  ;;  %s20_s26 = sshll.u32 %s446_s1, 4  ;;  %s287_s27 = smov [#allocation2]   ;;  %s21_s26 = int_to_ptr.hbm [resolvable:$true] %s20_s26 }
   0x2   :  { %s22_s28 = sshll.u32 %s287_s27, 4  ;;  %s288_s29 = smov 128   ;;  %s23_s28 = int_to_ptr.vmem [resolvable:$true] %s22_s28 }
   0x3   :  { %s289_s30 = smov 8  }
   0x4   :  { %28 = dma.hbm_to_vmem [thread:$0]  %s21_s26, 512, %s23_s28, [#allocation3], %s288_s29, %s288_s29, %s289_s30  }
   0x5   :  { %283 = dma.done.wait [#allocation3], 512  }
   0x6   :  { %284 = vsyncadd [#allocation3], 4294966784  ;;  %v47_v0 = vld [vmem:[#allocation2 + $0x18] sm:$0xff]  ;;  %v46_v1 = vld [vmem:[#allocation2 + $0x10] sm:$0xff]  ;;  %vm52_vm0 = vcmask 261120   ;;  %s290_s21 = smov [#allocation5]  }
   0x7   :  { %68 = vmatpush.msra.mxu0 %v47_v0  ;;  %v45_v2 = vld [vmem:[#allocation2 + $0x8] sm:$0xff]  ;;  %v44_v3 = vld [vmem:[#allocation2] sm:$0xff]  ;;  %v115_v10 = vld [vmem:[%s448_s3 + $0x78] sm:$0xff]  ;;  %s213_s24 = sshll.u32 %s452_s7, 4  ;;  %vm204_vm7 = vcmask 130048   ;;  %s214_s24 = int_to_ptr.hbm [resolvable:$true] %s213_s24 }
   0x8   :  { %v43_v4 = vld [vmem:[%s445_s0] sm:$0xff]  ;;  %v114_v11 = vld [vmem:[%s448_s3 + $0x70] sm:$0xff]  ;;  %120 = vmatpush.msra.mxu1 %v115_v10  ;;  %v113_v12 = vld [vmem:[%s448_s3 + $0x68] sm:$0xff] }
   0x9   :  { %69 = vmatpush.msra.mxu0 %v46_v1  ;;  %v228_v5 = vld [vmem:[%s447_s2] ss:$0 sm:$0xff]  ;;  %v111_v14 = vld [vmem:[%s448_s3 + $0x58] sm:$0xff]  ;;  %v110_v15 = vld [vmem:[%s448_s3 + $0x50] sm:$0xff] }
   0xa   :  { %121 = vmatpush.msra.mxu1 %v114_v11  ;;  %v112_v13 = vld [vmem:[%s448_s3 + $0x60] sm:$0xff]  ;;  %v109_v16 = vld [vmem:[%s448_s3 + $0x48] sm:$0xff]  ;;  %v107_v18 = vld [vmem:[%s448_s3 + $0x38] sm:$0xff] }
   0xb   :  { %70 = vmatpush.msra.mxu0 %v45_v2  ;;  %v108_v17 = vld [vmem:[%s448_s3 + $0x40] sm:$0xff]  ;;  %v106_v19 = vld [vmem:[%s448_s3 + $0x30] sm:$0xff]  ;;  %v105_v20 = vld [vmem:[%s448_s3 + $0x28] sm:$0xff] }
   0xc   :  { %122 = vmatpush.msra.mxu1 %v113_v12  ;;  %v104_v21 = vld [vmem:[%s448_s3 + $0x20] sm:$0xff]  ;;  %v103_v22 = vld [vmem:[%s448_s3 + $0x18] sm:$0xff]  ;;  %v102_v23 = vld [vmem:[%s448_s3 + $0x10] sm:$0xff] }
   0xd   :  { %71 = vmatpush.msra.mxu0 %v44_v3  ;;  %v101_v24 = vld [vmem:[%s448_s3 + $0x8] sm:$0xff]  ;;  %v100_v26 = vld [vmem:[%s448_s3] sm:$0xff]  ;;  %v179_v48 = vld [vmem:[%s450_s5 + $0x78] sm:$0xff] }
   0xe   :  { %223 = vmatmul.msk.f32.vlgmr.msra.gmra.mxu0 %vm52_vm0, %v43_v4  ;;  %123 = vmatpush.msra.mxu1 %v112_v13  ;;  %v229_v43 = vld [vmem:[%s449_s4] ss:$0 sm:$0xff]  ;;  %v178_v49 = vld [vmem:[%s450_s5 + $0x70] sm:$0xff]  ;;  %v177_v50 = vld [vmem:[%s450_s5 + $0x68] sm:$0xff]  ;;  %s211_s4 = sshll.u32 %s290_s21, 4  ;;  %s212_s4 = int_to_ptr.vmem [resolvable:$true] %s211_s4 }
   0xf   :  { %184 = vmatpush.msra.mxu2 %v179_v48  ;;  %v176_v51 = vld [vmem:[%s450_s5 + $0x60] sm:$0xff]  ;;  %v175_v52 = vld [vmem:[%s450_s5 + $0x58] sm:$0xff]  ;;  %v174_v53 = vld [vmem:[%s450_s5 + $0x50] sm:$0xff] }
  0x10   :  { %124 = vmatpush.msra.mxu1 %v111_v14  ;;  %v173_v54 = vld [vmem:[%s450_s5 + $0x48] sm:$0xff]  ;;  %v172_v55 = vld [vmem:[%s450_s5 + $0x40] sm:$0xff]  ;;  %v171_v56 = vld [vmem:[%s450_s5 + $0x38] sm:$0xff] }
  0x11   :  { %185 = vmatpush.msra.mxu2 %v178_v49  ;;  %v170_v57 = vld [vmem:[%s450_s5 + $0x30] sm:$0xff]  ;;  %v169_v58 = vld [vmem:[%s450_s5 + $0x28] sm:$0xff]  ;;  %v168_v59 = vld [vmem:[%s450_s5 + $0x20] sm:$0xff] }
  0x12   :  { %125 = vmatpush.msra.mxu1 %v110_v15  ;;  %v167_v60 = vld [vmem:[%s450_s5 + $0x18] sm:$0xff]  ;;  %v166_v61 = vld [vmem:[%s450_s5 + $0x10] sm:$0xff]  ;;  %v165_v62 = vld [vmem:[%s450_s5 + $0x8] sm:$0xff] }
  0x13   :  { %186 = vmatpush.msra.mxu2 %v177_v50  ;;  %v164_v0 = vld [vmem:[%s450_s5] sm:$0xff] }
  0x14   :  { %126 = vmatpush.msra.mxu1 %v109_v16 }
  0x15   :  { %187 = vmatpush.msra.mxu2 %v176_v51 }
  0x16   :  { %127 = vmatpush.msra.mxu1 %v108_v17  ;;  %v230_v17 = vld [vmem:[%s451_s6] ss:$0 sm:$0xff] }
  0x17   :  { %188 = vmatpush.msra.mxu2 %v175_v52 }
  0x18   :  { %128 = vmatpush.msra.mxu1 %v107_v18 }
  0x19   :  { %189 = vmatpush.msra.mxu2 %v174_v53 }
  0x1a   :  { %129 = vmatpush.msra.mxu1 %v106_v19 }
  0x1b   :  { %190 = vmatpush.msra.mxu2 %v173_v54 }
  0x1c   :  { %130 = vmatpush.msra.mxu1 %v105_v20 }
  0x1d   :  { %191 = vmatpush.msra.mxu2 %v172_v55 }
  0x1e   :  { %131 = vmatpush.msra.mxu1 %v104_v21 }
  0x1f   :  { %192 = vmatpush.msra.mxu2 %v171_v56 }
  0x20   :  { %132 = vmatpush.msra.mxu1 %v103_v22 }
  0x21   :  { %193 = vmatpush.msra.mxu2 %v170_v57 }
  0x22   :  { %133 = vmatpush.msra.mxu1 %v102_v23 }
  0x23   :  { %194 = vmatpush.msra.mxu2 %v169_v58 }
  0x24   :  { %134 = vmatpush.msra.mxu1 %v101_v24 }
  0x25   :  { %195 = vmatpush.msra.mxu2 %v168_v59 }
  0x26   :  { %135 = vmatpush.msra.mxu1 %v100_v26 }
  0x27   :  { %196 = vmatpush.msra.mxu2 %v167_v60 }
  0x29   :  { %197 = vmatpush.msra.mxu2 %v166_v61 }
  0x2b   :  { %198 = vmatpush.msra.mxu2 %v165_v62 }
  0x2d   :  { %199 = vmatpush.msra.mxu2 %v164_v0 }
  0x8b   :  { %v73_v6 = vpop.f32.mrf.mxu0 }
  0x8c   :  { %v74_v7 = vadd.f32 %v228_v5, %v73_v6 }
  0x8e   :  { %v76_v8 = vmax.f32 %v74_v7, 0.0 }
  0x90   :  { %77 = vadd.xlane.f32.xlu0 %v76_v8  ;;  %v80_v9 = vmul.f32 %v76_v8, %v76_v8 }
  0x98   :  { %81 = vadd.xlane.f32.xlu0 %v80_v9 }
 0x103   :  { %v78_v25 = vpop.xlane.xlu0 %77 }
 0x104   :  { %v79_v27 = vmul.f32 0.03125, %v78_v25 }
 0x106   :  { %v84_v29 = vmul.f32 %v79_v27, %v79_v27  ;;  %v87_v40 = vsub.f32 %v76_v8, %v79_v27 }
 0x10b   :  { %v82_v28 = vpop.xlane.xlu0 %81 }
 0x10c   :  { %v83_v30 = vmul.f32 0.03125, %v82_v28 }
 0x10e   :  { %v85_v31 = vsub.f32 %v83_v30, %v84_v29 }
 0x110   :  { %v86_v32 = vmax.f32 %v85_v31, 0.0 }
 0x112   :  { %v88_v33 = vadd.f32 1e-05, %v86_v32 }
 0x114   :  { %231 = vrsqrt.f32 %v88_v33  ;;  %vm95_vm2 = vweird.f32 %v88_v33 }
 0x11a   :  { %v232_v34 = vpop.eup %231 }
 0x11b   :  { %v90_v35 = vmul.f32 %v232_v34, %v88_v33  ;;  %vm96_vm1 = vweird.f32 %v232_v34 }
 0x11c   :  { %vm97_vm3 = vmor %vm95_vm2, %vm96_vm1 }
 0x11d   :  { %v91_v36 = vmul.f32 %v232_v34, %v90_v35 }
 0x11f   :  { %v92_v37 = vmul.f32 0.5, %v91_v36 }
 0x121   :  { %v93_v38 = vsub.f32 1.5, %v92_v37 }
 0x123   :  { %v94_v39 = vmul.f32 %v232_v34, %v93_v38 }
 0x125   :  { %v98_v41 = vsel %vm97_vm3, %v232_v34, %v94_v39 }
 0x126   :  { %v99_v42 = vmul.f32 %v98_v41, %v87_v40 }
 0x128   :  { %136 = vmatmul.f32.vlgmr.msra.gmra.mxu1 %v99_v42 }
 0x1a5   :  { %v137_v44 = vpop.f32.mrf.mxu1 }
 0x1a6   :  { %v138_v45 = vadd.f32 %v229_v43, %v137_v44 }
 0x1a8   :  { %v140_v46 = vmax.f32 %v138_v45, 0.0 }
 0x1aa   :  { %141 = vadd.xlane.f32.xlu1 %v140_v46  ;;  %v144_v47 = vmul.f32 %v140_v46, %v140_v46 }
 0x1b2   :  { %145 = vadd.xlane.f32.xlu1 %v144_v47 }
 0x21d   :  { %v142_v63 = vpop.xlane.xlu1 %141 }
 0x21e   :  { %v143_v1 = vmul.f32 0.03125, %v142_v63 }
 0x220   :  { %v148_v3 = vmul.f32 %v143_v1, %v143_v1  ;;  %v151_v14 = vsub.f32 %v140_v46, %v143_v1 }
 0x225   :  { %v146_v2 = vpop.xlane.xlu1 %145 }
 0x226   :  { %v147_v4 = vmul.f32 0.03125, %v146_v2 }
 0x228   :  { %v149_v5 = vsub.f32 %v147_v4, %v148_v3 }
 0x22a   :  { %v150_v6 = vmax.f32 %v149_v5, 0.0 }
 0x22c   :  { %v152_v7 = vadd.f32 1e-05, %v150_v6 }
 0x22e   :  { %233 = vrsqrt.f32 %v152_v7  ;;  %vm159_vm5 = vweird.f32 %v152_v7 }
 0x234   :  { %v234_v8 = vpop.eup %233 }
 0x235   :  { %v154_v9 = vmul.f32 %v234_v8, %v152_v7  ;;  %vm160_vm4 = vweird.f32 %v234_v8 }
 0x236   :  { %vm161_vm6 = vmor %vm159_vm5, %vm160_vm4 }
 0x237   :  { %v155_v10 = vmul.f32 %v234_v8, %v154_v9 }
 0x239   :  { %v156_v11 = vmul.f32 0.5, %v155_v10 }
 0x23b   :  { %v157_v12 = vsub.f32 1.5, %v156_v11 }
 0x23d   :  { %v158_v13 = vmul.f32 %v234_v8, %v157_v12 }
 0x23f   :  { %v162_v15 = vsel %vm161_vm6, %v234_v8, %v158_v13 }
 0x240   :  { %v163_v16 = vmul.f32 %v162_v15, %v151_v14 }
 0x242   :  { %200 = vmatmul.f32.vlgmr.msra.gmra.mxu2 %v163_v16 }
 0x2c5   :  { %v201_v18 = vpop.f32.mrf.mxu2 }
 0x2c6   :  { %v202_v19 = vadd.f32 %v230_v17, %v201_v18 }
 0x2c8   :  { %205 = vst.msk [vmem:[#allocation5] sm:$0xff] %vm204_vm7, %v202_v19 }
 0x2c9   :  { %216 = dma.vmem_to_hbm [thread:$0]  %s212_s4, 128, %s214_s24, [#allocation4]  }
 0x2ca   :  { %285 = dma.done.wait [#allocation4], 128  }
 0x2cb   :  { %286 = vsyncadd [#allocation4], 4294967168 }
 0x2cc   :  { %221 = vsyncpa [#allocation3], 1 }
 0x2cd   :  { %222 = vsyncpa [#allocation4], 1 }

</bundles_post_ra>
